<compile_context>
chip_gen: v7x
topology: tpu7x:2x2x1
jax: 0.10.0
libtpu: 0.0.40
codegen_flags: <defaults>
</compile_context>

<pallas_src>
import functools
import math

import jax
import jax.numpy as jnp
import numpy as np
from jax.experimental import pallas as pl
from jax.experimental.pallas import tpu as pltpu


def _resblock_kernel(x_ref, w1_ref, w2_ref, out_ref, stage_ref,
                     *, W, OFF, eps, compute_dtype):
    # x_ref    : (C, H*W)     lane-dense input block (VMEM)
    # w*_ref   : (3, C, 3*C)  per-dw fused weights: [kw, c_out, kh*C + c_in]
    # out_ref  : (C, H*W)     output block (VMEM)
    # stage_ref: (3*C, L)     staging scratch; rows [kh*C,(kh+1)*C) hold the
    #                         dh = kh-1 shifted copy of the conv source,
    #                         L = 2*OFF + H*W, stored in compute_dtype.
    C, HW = x_ref.shape
    C3, L = stage_ref.shape
    SW = OFF + W                         # halo strip width

    # (Re)zero only the two halo strips; together with the interior writes
    # below they cover every lane of every dh block each step.
    zstrip = jnp.zeros((C3, SW), compute_dtype)
    stage_ref[:, 0:SW] = zstrip
    stage_ref[:, L - SW:L] = zstrip

    # Column-validity masks for the dw = -1 / +1 groups; applied to the matmul
    # outputs (lanes pass through the contraction unchanged, so this is exact).
    col = jax.lax.broadcasted_iota(jnp.int32, (C, HW), 1) % W
    not_first_col = col != 0             # valid lanes of the dw = -1 group
    not_last_col = col != (W - 1)        # valid lanes of the dw = +1 group

    inv_hw = 1.0 / HW

    def stage(src):
        # Write the three dh-shifted copies (dh = kh - 1); block kh's interior
        # starts at lane OFF - dh*W so every dw-group operand below is a single
        # contiguous lane window of the whole (3C, L) scratch.
        for kh in range(3):
            off = OFF - (kh - 1) * W
            stage_ref[kh * C:(kh + 1) * C, off:off + HW] = src

    def conv3x3_instnorm(w_ref):
        # Three independent fused-K dots (K = 3C), one per dw group.
        parts = []
        for kw in range(3):
            s = OFF + (kw - 1)
            parts.append(jnp.dot(w_ref[kw], stage_ref[:, s:s + HW],
                                 preferred_element_type=jnp.float32))
        acc = (jnp.where(not_first_col, parts[0], 0.0)
               + parts[1]
               + jnp.where(not_last_col, parts[2], 0.0))
        # One-pass InstanceNorm statistics (biased variance), all in f32.
        mu = jnp.sum(acc, axis=1, keepdims=True) * inv_hw
        ex2 = jnp.sum(acc * acc, axis=1, keepdims=True) * inv_hw
        var = ex2 - mu * mu
        return (acc - mu) * jax.lax.rsqrt(var + eps)

    # conv1 + InstanceNorm + ReLU
    stage(x_ref[...].astype(compute_dtype))
    h1 = conv3x3_instnorm(w1_ref)

    # conv2 + InstanceNorm (staging scratch reused; halo strips still zero)
    stage(jnp.maximum(h1, 0.0).astype(compute_dtype))
    h2 = conv3x3_instnorm(w2_ref)

    # Residual: re-read x from the resident input block instead of keeping it
    # live in vregs across both convs.
    out_ref[...] = (x_ref[...].astype(jnp.float32) + h2).astype(out_ref.dtype)


def resblock(x, w1, b1, w2, b2, *, compute_dtype=jnp.bfloat16):
    # b1/b2 accepted for API parity with the PyTorch module but unused: a
    # per-channel bias added right before InstanceNorm is exactly cancelled by
    # the per-channel mean subtraction (mathematically a no-op).
    del b1, b2
    N, C, H, W = x.shape
    HW = H * W
    OFF = ((max(W, 1) + 127) // 128) * 128   # lane-aligned halo offset, >= W
    L = 2 * OFF + HW
    eps = 1e-5

    x_flat = x.reshape(N, C, HW)

    # OIHW -> (kw, C_out, kh*C_in + c_in): per-dw fused weights for K=3C dots.
    def fuse(w):
        return (jnp.transpose(w, (3, 0, 2, 1))
                .reshape(3, C, 3 * C).astype(compute_dtype))

    w1_t, w2_t = fuse(w1), fuse(w2)

    kernel = functools.partial(_resblock_kernel, W=W, OFF=OFF, eps=eps,
                               compute_dtype=compute_dtype)

    out_flat = pl.pallas_call(
        kernel,
        out_shape=jax.ShapeDtypeStruct((N, C, HW), x.dtype),
        grid=(N,),
        in_specs=[
            pl.BlockSpec((None, C, HW), lambda n: (n, 0, 0)),   # x (lane-dense)
            pl.BlockSpec((3, C, 3 * C), lambda n: (0, 0, 0)),   # w1 (grid-invariant)
            pl.BlockSpec((3, C, 3 * C), lambda n: (0, 0, 0)),   # w2 (grid-invariant)
        ],
        out_specs=pl.BlockSpec((None, C, HW), lambda n: (n, 0, 0)),
        scratch_shapes=[
            pltpu.VMEM((3 * C, L), compute_dtype),   # shared dh-shifted staging
        ],
        compiler_params=pltpu.CompilerParams(
            dimension_semantics=("parallel",),
            vmem_limit_bytes=32 * 1024 * 1024),
    )(x_flat, w1_t, w2_t)
    return out_flat.reshape(N, C, H, W)


def resblock_reference(x, w1, b1, w2, b2):
    def conv(h, w, b):
        y = jax.lax.conv_general_dilated(
            h, w, (1, 1), "SAME",
            dimension_numbers=("NCHW", "OIHW", "NCHW"),
            precision=jax.lax.Precision.HIGHEST,
        )
        return y + b[None, :, None, None]

    def inorm(y):
        mu = jnp.mean(y, axis=(2, 3), keepdims=True)
        var = jnp.mean((y - mu) ** 2, axis=(2, 3), keepdims=True)
        return (y - mu) * jax.lax.rsqrt(var + 1e-5)

    h = jnp.maximum(inorm(conv(x, w1, b1)), 0.0)
    return x + inorm(conv(h, w2, b2))


if __name__ == "__main__":
    N, C, H, W = 2, 4, 16, 16  # in_features = 4
    key = jax.random.PRNGKey(0)
    kx, kw1, kb1, kw2, kb2 = jax.random.split(key, 5)

    x = jax.random.normal(kx, (N, C, H, W), jnp.float32)

    # Deterministic synthetic parameters (PyTorch-default-like uniform bounds).
    fan_in = C * 3 * 3
    bound = 1.0 / math.sqrt(fan_in)
    w1 = jax.random.uniform(kw1, (C, C, 3, 3), jnp.float32, -bound, bound)
    b1 = jax.random.uniform(kb1, (C,), jnp.float32, -bound, bound)
    w2 = jax.random.uniform(kw2, (C, C, 3, 3), jnp.float32, -bound, bound)
    b2 = jax.random.uniform(kb2, (C,), jnp.float32, -bound, bound)

    ref = jax.block_until_ready(resblock_reference(x, w1, b1, w2, b2))

    # Structural-exactness check: f32 MXU operands must match the reference.
    out_f32 = jax.block_until_ready(
        resblock(x, w1, b1, w2, b2, compute_dtype=jnp.float32))
    np.testing.assert_allclose(np.asarray(out_f32), np.asarray(ref),
                               rtol=5e-4, atol=5e-4)

    # Default fast path: bf16 MXU operands, f32 accumulation / statistics.
    # Two chained conv+norm stages through bf16 operands need a looser bound.
    out_bf16 = jax.block_until_ready(resblock(x, w1, b1, w2, b2))
    np.testing.assert_allclose(np.asarray(out_bf16), np.asarray(ref),
                               rtol=5e-2, atol=1e-1)

    print("KERNEL_OK")
</pallas_src>

<mosaic_0001>
module attributes {stable_mosaic.version = 11 : i64} {
  func.func @_resblock_kernel(%arg0: i32, %arg1: memref<1x4x256xf32, #tpu.memory_space<vmem>>, %arg2: memref<3x4x12xf32, #tpu.memory_space<vmem>>, %arg3: memref<3x4x12xf32, #tpu.memory_space<vmem>>, %arg4: memref<1x4x256xf32, #tpu.memory_space<vmem>>, %arg5: memref<12x512xf32, #tpu.memory_space<vmem>>) attributes {dimension_semantics = [#tpu.dimension_semantics<parallel>], iteration_bounds = array<i64: 2>, scalar_prefetch = 0 : i64, scratch_operands = 1 : i64, tpu.core_type = #tpu.core_type<tc>, window_params = [{transform_indices = @transform_0, window_bounds = array<i64: 1, 4, 256>}, {pipeline_mode = #tpu.pipeline_mode<synchronous>, transform_indices = @transform_1, window_bounds = array<i64: 3, 4, 12>}, {pipeline_mode = #tpu.pipeline_mode<synchronous>, transform_indices = @transform_2, window_bounds = array<i64: 3, 4, 12>}, {transform_indices = @transform_3, window_bounds = array<i64: 1, 4, 256>}]} {
    %cst = arith.constant 0.000000e+00 : f32
    %0 = vector.broadcast %cst : f32 to vector<12x144xf32>
    %c0 = arith.constant 0 : index
    %c0_0 = arith.constant 0 : index
    %1 = vector.load %arg5[%c0, %c0_0] : memref<12x512xf32, #tpu.memory_space<vmem>>, vector<12x144xf32>
    tpu.vector_store %arg5[%c0, %c0_0], %0 {strides = array<i32>} : memref<12x512xf32, #tpu.memory_space<vmem>>, vector<12x144xf32>,
    %c0_1 = arith.constant 0 : index
    %c368 = arith.constant 368 : index
    %2 = vector.load %arg5[%c0_1, %c368] : memref<12x512xf32, #tpu.memory_space<vmem>>, vector<12x144xf32>
    tpu.vector_store %arg5[%c0_1, %c368], %0 {strides = array<i32>} : memref<12x512xf32, #tpu.memory_space<vmem>>, vector<12x144xf32>,
    %3 = tpu.iota {dimensions = array<i32: 1>} : vector<4x256xi32>
    %c16_i32 = arith.constant 16 : i32
    %c0_i32 = arith.constant 0 : i32
    %4 = arith.cmpi eq, %c16_i32, %c0_i32 : i32
    %c1_i32 = arith.constant 1 : i32
    %5 = arith.select %4, %c1_i32, %c16_i32 : i32
    %6 = vector.broadcast %5 : i32 to vector<4x256xi32>
    %7 = arith.remsi %3, %6 : vector<4x256xi32>
    %c0_i32_2 = arith.constant 0 : i32
    %8 = vector.broadcast %c0_i32_2 : i32 to vector<4x256xi32>
    %9 = arith.cmpi ne, %7, %8 : vector<4x256xi32>
    %c0_i32_3 = arith.constant 0 : i32
    %10 = vector.broadcast %c0_i32_3 : i32 to vector<4x256xi32>
    %11 = arith.cmpi slt, %7, %10 : vector<4x256xi32>
    %c0_i32_4 = arith.constant 0 : i32
    %12 = arith.cmpi slt, %5, %c0_i32_4 : i32
    %13 = vector.broadcast %12 : i1 to vector<4x256xi1>
    %14 = vector.broadcast %13 : vector<4x256xi1> to vector<4x256xi1>
    %15 = arith.xori %11, %14 : vector<4x256xi1>
    %16 = arith.andi %15, %9 : vector<4x256xi1>
    %17 = vector.broadcast %5 : i32 to vector<4x256xi32>
    %18 = arith.addi %7, %17 : vector<4x256xi32>
    %19 = arith.select %16, %18, %7 : vector<4x256xi1>, vector<4x256xi32>
    %c0_i32_5 = arith.constant 0 : i32
    %20 = vector.broadcast %c0_i32_5 : i32 to vector<4x256xi32>
    %21 = arith.cmpi ne, %19, %20 : vector<4x256xi32>
    %c15_i32 = arith.constant 15 : i32
    %22 = vector.broadcast %c15_i32 : i32 to vector<4x256xi32>
    %23 = arith.cmpi ne, %19, %22 : vector<4x256xi32>
    %c0_6 = arith.constant 0 : index
    %c0_7 = arith.constant 0 : index
    %c0_8 = arith.constant 0 : index
    %24 = vector.load %arg1[%c0_6, %c0_7, %c0_8] : memref<1x4x256xf32, #tpu.memory_space<vmem>>, vector<1x4x256xf32>
    %25 = vector.shape_cast %24 : vector<1x4x256xf32> to vector<4x256xf32>
    %c0_9 = arith.constant 0 : index
    %c144 = arith.constant 144 : index
    %26 = vector.load %arg5[%c0_9, %c144] : memref<12x512xf32, #tpu.memory_space<vmem>>, vector<4x256xf32>
    tpu.vector_store %arg5[%c0_9, %c144], %25 {strides = array<i32>} : memref<12x512xf32, #tpu.memory_space<vmem>>, vector<4x256xf32>,
    %c4 = arith.constant 4 : index
    %c128 = arith.constant 128 : index
    %27 = vector.load %arg5[%c4, %c128] : memref<12x512xf32, #tpu.memory_space<vmem>>, vector<4x256xf32>
    tpu.vector_store %arg5[%c4, %c128], %25 {strides = array<i32>} : memref<12x512xf32, #tpu.memory_space<vmem>>, vector<4x256xf32>,
    %c8 = arith.constant 8 : index
    %c112 = arith.constant 112 : index
    %28 = vector.load %arg5[%c8, %c112] : memref<12x512xf32, #tpu.memory_space<vmem>>, vector<4x256xf32>
    tpu.vector_store %arg5[%c8, %c112], %25 {strides = array<i32>} : memref<12x512xf32, #tpu.memory_space<vmem>>, vector<4x256xf32>,
    %c0_10 = arith.constant 0 : index
    %c0_11 = arith.constant 0 : index
    %c0_12 = arith.constant 0 : index
    %29 = vector.load %arg2[%c0_10, %c0_11, %c0_12] : memref<3x4x12xf32, #tpu.memory_space<vmem>>, vector<1x4x12xf32>
    %30 = vector.shape_cast %29 : vector<1x4x12xf32> to vector<4x12xf32>
    %c0_13 = arith.constant 0 : index
    %c127 = arith.constant 127 : index
    %31 = vector.load %arg5[%c0_13, %c127] : memref<12x512xf32, #tpu.memory_space<vmem>>, vector<12x256xf32>
    %cst_14 = arith.constant dense<0.000000e+00> : vector<4x256xf32>
    %32 = tpu.matmul %30, %31, %cst_14 {dimension_numbers = #tpu.dot_dimension_numbers<[1], [0], [0], [1], [0, 0, 1, 1], [], []>} : vector<4x12xf32>, vector<12x256xf32>, vector<4x256xf32> -> vector<4x256xf32>
    %c1 = arith.constant 1 : index
    %c0_15 = arith.constant 0 : index
    %c0_16 = arith.constant 0 : index
    %33 = vector.load %arg2[%c1, %c0_15, %c0_16] : memref<3x4x12xf32, #tpu.memory_space<vmem>>, vector<1x4x12xf32>
    %34 = vector.shape_cast %33 : vector<1x4x12xf32> to vector<4x12xf32>
    %c0_17 = arith.constant 0 : index
    %c128_18 = arith.constant 128 : index
    %35 = vector.load %arg5[%c0_17, %c128_18] : memref<12x512xf32, #tpu.memory_space<vmem>>, vector<12x256xf32>
    %cst_19 = arith.constant dense<0.000000e+00> : vector<4x256xf32>
    %36 = tpu.matmul %34, %35, %cst_19 {dimension_numbers = #tpu.dot_dimension_numbers<[1], [0], [0], [1], [0, 0, 1, 1], [], []>} : vector<4x12xf32>, vector<12x256xf32>, vector<4x256xf32> -> vector<4x256xf32>
    %c2 = arith.constant 2 : index
    %c0_20 = arith.constant 0 : index
    %c0_21 = arith.constant 0 : index
    %37 = vector.load %arg2[%c2, %c0_20, %c0_21] : memref<3x4x12xf32, #tpu.memory_space<vmem>>, vector<1x4x12xf32>
    %38 = vector.shape_cast %37 : vector<1x4x12xf32> to vector<4x12xf32>
    %c0_22 = arith.constant 0 : index
    %c129 = arith.constant 129 : index
    %39 = vector.load %arg5[%c0_22, %c129] : memref<12x512xf32, #tpu.memory_space<vmem>>, vector<12x256xf32>
    %cst_23 = arith.constant dense<0.000000e+00> : vector<4x256xf32>
    %40 = tpu.matmul %38, %39, %cst_23 {dimension_numbers = #tpu.dot_dimension_numbers<[1], [0], [0], [1], [0, 0, 1, 1], [], []>} : vector<4x12xf32>, vector<12x256xf32>, vector<4x256xf32> -> vector<4x256xf32>
    %cst_24 = arith.constant 0.000000e+00 : f32
    %41 = vector.broadcast %cst_24 : f32 to vector<4x256xf32>
    %42 = arith.select %21, %32, %41 : vector<4x256xi1>, vector<4x256xf32>
    %43 = arith.addf %42, %36 : vector<4x256xf32>
    %cst_25 = arith.constant 0.000000e+00 : f32
    %44 = vector.broadcast %cst_25 : f32 to vector<4x256xf32>
    %45 = arith.select %23, %40, %44 : vector<4x256xi1>, vector<4x256xf32>
    %46 = arith.addf %43, %45 : vector<4x256xf32>
    %cst_26 = arith.constant dense<0.000000e+00> : vector<4xf32>
    %47 = vector.multi_reduction <add>, %46, %cst_26 [1] : vector<4x256xf32> to vector<4xf32>
    %48 = vector.shape_cast %47 : vector<4xf32> to vector<4x1xf32>
    %cst_27 = arith.constant 3.906250e-03 : f32
    %49 = vector.broadcast %cst_27 : f32 to vector<4x1xf32>
    %50 = arith.mulf %48, %49 : vector<4x1xf32>
    %51 = arith.mulf %46, %46 : vector<4x256xf32>
    %cst_28 = arith.constant dense<0.000000e+00> : vector<4xf32>
    %52 = vector.multi_reduction <add>, %51, %cst_28 [1] : vector<4x256xf32> to vector<4xf32>
    %53 = vector.shape_cast %52 : vector<4xf32> to vector<4x1xf32>
    %cst_29 = arith.constant 3.906250e-03 : f32
    %54 = vector.broadcast %cst_29 : f32 to vector<4x1xf32>
    %55 = arith.mulf %53, %54 : vector<4x1xf32>
    %56 = arith.mulf %50, %50 : vector<4x1xf32>
    %57 = arith.subf %55, %56 : vector<4x1xf32>
    %58 = vector.broadcast %50 : vector<4x1xf32> to vector<4x256xf32>
    %59 = arith.subf %46, %58 : vector<4x256xf32>
    %cst_30 = arith.constant 9.99999974E-6 : f32
    %60 = vector.broadcast %cst_30 : f32 to vector<4x1xf32>
    %61 = arith.addf %57, %60 : vector<4x1xf32>
    %62 = math.rsqrt %61 : vector<4x1xf32>
    %63 = vector.broadcast %62 : vector<4x1xf32> to vector<4x256xf32>
    %64 = arith.mulf %59, %63 : vector<4x256xf32>
    %cst_31 = arith.constant 0.000000e+00 : f32
    %65 = vector.broadcast %cst_31 : f32 to vector<4x256xf32>
    %66 = arith.maximumf %64, %65 : vector<4x256xf32>
    %c0_32 = arith.constant 0 : index
    %c144_33 = arith.constant 144 : index
    %67 = vector.load %arg5[%c0_32, %c144_33] : memref<12x512xf32, #tpu.memory_space<vmem>>, vector<4x256xf32>
    tpu.vector_store %arg5[%c0_32, %c144_33], %66 {strides = array<i32>} : memref<12x512xf32, #tpu.memory_space<vmem>>, vector<4x256xf32>,
    %c4_34 = arith.constant 4 : index
    %c128_35 = arith.constant 128 : index
    %68 = vector.load %arg5[%c4_34, %c128_35] : memref<12x512xf32, #tpu.memory_space<vmem>>, vector<4x256xf32>
    tpu.vector_store %arg5[%c4_34, %c128_35], %66 {strides = array<i32>} : memref<12x512xf32, #tpu.memory_space<vmem>>, vector<4x256xf32>,
    %c8_36 = arith.constant 8 : index
    %c112_37 = arith.constant 112 : index
    %69 = vector.load %arg5[%c8_36, %c112_37] : memref<12x512xf32, #tpu.memory_space<vmem>>, vector<4x256xf32>
    tpu.vector_store %arg5[%c8_36, %c112_37], %66 {strides = array<i32>} : memref<12x512xf32, #tpu.memory_space<vmem>>, vector<4x256xf32>,
    %c0_38 = arith.constant 0 : index
    %c0_39 = arith.constant 0 : index
    %c0_40 = arith.constant 0 : index
    %70 = vector.load %arg3[%c0_38, %c0_39, %c0_40] : memref<3x4x12xf32, #tpu.memory_space<vmem>>, vector<1x4x12xf32>
    %71 = vector.shape_cast %70 : vector<1x4x12xf32> to vector<4x12xf32>
    %c0_41 = arith.constant 0 : index
    %c127_42 = arith.constant 127 : index
    %72 = vector.load %arg5[%c0_41, %c127_42] : memref<12x512xf32, #tpu.memory_space<vmem>>, vector<12x256xf32>
    %cst_43 = arith.constant dense<0.000000e+00> : vector<4x256xf32>
    %73 = tpu.matmul %71, %72, %cst_43 {dimension_numbers = #tpu.dot_dimension_numbers<[1], [0], [0], [1], [0, 0, 1, 1], [], []>} : vector<4x12xf32>, vector<12x256xf32>, vector<4x256xf32> -> vector<4x256xf32>
    %c1_44 = arith.constant 1 : index
    %c0_45 = arith.constant 0 : index
    %c0_46 = arith.constant 0 : index
    %74 = vector.load %arg3[%c1_44, %c0_45, %c0_46] : memref<3x4x12xf32, #tpu.memory_space<vmem>>, vector<1x4x12xf32>
    %75 = vector.shape_cast %74 : vector<1x4x12xf32> to vector<4x12xf32>
    %c0_47 = arith.constant 0 : index
    %c128_48 = arith.constant 128 : index
    %76 = vector.load %arg5[%c0_47, %c128_48] : memref<12x512xf32, #tpu.memory_space<vmem>>, vector<12x256xf32>
    %cst_49 = arith.constant dense<0.000000e+00> : vector<4x256xf32>
    %77 = tpu.matmul %75, %76, %cst_49 {dimension_numbers = #tpu.dot_dimension_numbers<[1], [0], [0], [1], [0, 0, 1, 1], [], []>} : vector<4x12xf32>, vector<12x256xf32>, vector<4x256xf32> -> vector<4x256xf32>
    %c2_50 = arith.constant 2 : index
    %c0_51 = arith.constant 0 : index
    %c0_52 = arith.constant 0 : index
    %78 = vector.load %arg3[%c2_50, %c0_51, %c0_52] : memref<3x4x12xf32, #tpu.memory_space<vmem>>, vector<1x4x12xf32>
    %79 = vector.shape_cast %78 : vector<1x4x12xf32> to vector<4x12xf32>
    %c0_53 = arith.constant 0 : index
    %c129_54 = arith.constant 129 : index
    %80 = vector.load %arg5[%c0_53, %c129_54] : memref<12x512xf32, #tpu.memory_space<vmem>>, vector<12x256xf32>
    %cst_55 = arith.constant dense<0.000000e+00> : vector<4x256xf32>
    %81 = tpu.matmul %79, %80, %cst_55 {dimension_numbers = #tpu.dot_dimension_numbers<[1], [0], [0], [1], [0, 0, 1, 1], [], []>} : vector<4x12xf32>, vector<12x256xf32>, vector<4x256xf32> -> vector<4x256xf32>
    %cst_56 = arith.constant 0.000000e+00 : f32
    %82 = vector.broadcast %cst_56 : f32 to vector<4x256xf32>
    %83 = arith.select %21, %73, %82 : vector<4x256xi1>, vector<4x256xf32>
    %84 = arith.addf %83, %77 : vector<4x256xf32>
    %cst_57 = arith.constant 0.000000e+00 : f32
    %85 = vector.broadcast %cst_57 : f32 to vector<4x256xf32>
    %86 = arith.select %23, %81, %85 : vector<4x256xi1>, vector<4x256xf32>
    %87 = arith.addf %84, %86 : vector<4x256xf32>
    %cst_58 = arith.constant dense<0.000000e+00> : vector<4xf32>
    %88 = vector.multi_reduction <add>, %87, %cst_58 [1] : vector<4x256xf32> to vector<4xf32>
    %89 = vector.shape_cast %88 : vector<4xf32> to vector<4x1xf32>
    %cst_59 = arith.constant 3.906250e-03 : f32
    %90 = vector.broadcast %cst_59 : f32 to vector<4x1xf32>
    %91 = arith.mulf %89, %90 : vector<4x1xf32>
    %92 = arith.mulf %87, %87 : vector<4x256xf32>
    %cst_60 = arith.constant dense<0.000000e+00> : vector<4xf32>
    %93 = vector.multi_reduction <add>, %92, %cst_60 [1] : vector<4x256xf32> to vector<4xf32>
    %94 = vector.shape_cast %93 : vector<4xf32> to vector<4x1xf32>
    %cst_61 = arith.constant 3.906250e-03 : f32
    %95 = vector.broadcast %cst_61 : f32 to vector<4x1xf32>
    %96 = arith.mulf %94, %95 : vector<4x1xf32>
    %97 = arith.mulf %91, %91 : vector<4x1xf32>
    %98 = arith.subf %96, %97 : vector<4x1xf32>
    %99 = vector.broadcast %91 : vector<4x1xf32> to vector<4x256xf32>
    %100 = arith.subf %87, %99 : vector<4x256xf32>
    %cst_62 = arith.constant 9.99999974E-6 : f32
    %101 = vector.broadcast %cst_62 : f32 to vector<4x1xf32>
    %102 = arith.addf %98, %101 : vector<4x1xf32>
    %103 = math.rsqrt %102 : vector<4x1xf32>
    %104 = vector.broadcast %103 : vector<4x1xf32> to vector<4x256xf32>
    %105 = arith.mulf %100, %104 : vector<4x256xf32>
    %c0_63 = arith.constant 0 : index
    %c0_64 = arith.constant 0 : index
    %c0_65 = arith.constant 0 : index
    %106 = vector.load %arg1[%c0_63, %c0_64, %c0_65] : memref<1x4x256xf32, #tpu.memory_space<vmem>>, vector<1x4x256xf32>
    %107 = vector.shape_cast %106 : vector<1x4x256xf32> to vector<4x256xf32>
    %108 = arith.addf %107, %105 : vector<4x256xf32>
    %c0_66 = arith.constant 0 : index
    %c0_67 = arith.constant 0 : index
    %c0_68 = arith.constant 0 : index
    %109 = vector.load %arg4[%c0_66, %c0_67, %c0_68] : memref<1x4x256xf32, #tpu.memory_space<vmem>>, vector<1x4x256xf32>
    %110 = vector.shape_cast %109 : vector<1x4x256xf32> to vector<4x256xf32>
    %111 = vector.shape_cast %108 : vector<4x256xf32> to vector<1x4x256xf32>
    tpu.vector_store %arg4[%c0_66, %c0_67, %c0_68], %111 {strides = array<i32>} : memref<1x4x256xf32, #tpu.memory_space<vmem>>, vector<1x4x256xf32>,
    return
  }
  func.func @transform_0(%arg0: i32) -> (i32, i32, i32) {
    %c0_i32 = arith.constant 0 : i32
    %c0_i32_0 = arith.constant 0 : i32
    %c0_i32_1 = arith.constant 0 : i32
    return %arg0, %c0_i32, %c0_i32_0 : i32, i32, i32
  }
  func.func @transform_1(%arg0: i32) -> (i32, i32, i32) {
    %c0_i32 = arith.constant 0 : i32
    %c0_i32_0 = arith.constant 0 : i32
    %c0_i32_1 = arith.constant 0 : i32
    %c0_i32_2 = arith.constant 0 : i32
    return %c0_i32, %c0_i32_0, %c0_i32_1 : i32, i32, i32
  }
  func.func @transform_2(%arg0: i32) -> (i32, i32, i32) {
    %c0_i32 = arith.constant 0 : i32
    %c0_i32_0 = arith.constant 0 : i32
    %c0_i32_1 = arith.constant 0 : i32
    %c0_i32_2 = arith.constant 0 : i32
    return %c0_i32, %c0_i32_0, %c0_i32_1 : i32, i32, i32
  }
  func.func @transform_3(%arg0: i32) -> (i32, i32, i32) {
    %c0_i32 = arith.constant 0 : i32
    %c0_i32_0 = arith.constant 0 : i32
    %c0_i32_1 = arith.constant 0 : i32
    return %arg0, %c0_i32, %c0_i32_0 : i32, i32, i32
  }
}

</mosaic_0001>

<bundles_post_ra>
// kernel: tpu_custom_call.1
= control target key start
LH: loop header
LB: loop body
LE: loop exit
PB: predicated region body
PF: predicated region fallthrough
CT: control target
= control target key end

     0   :  { %8 = vsyncpa [#allocation4], 0  ;;  %s1885_s0 = inlined_call_operand.hbm [shape: f32[2,4,256], index: 0, kind: input, shape index: {}]   ;;  %s1886_s1 = inlined_call_operand.hbm [shape: f32[3,4,12], index: 1, kind: input, shape index: {}]   ;;  %s1887_s2 = inlined_call_operand.hbm [shape: f32[3,4,12], index: 2, kind: input, shape index: {}]   ;;  %s1888_s3 = inlined_call_operand.hbm [shape: f32[2,4,256], index: 3, kind: output, shape index: {}]  }
   0x1   :  { %10 = vsyncpa [#allocation4 + $0x1], 0 }
   0x2   :  { %11 = vsyncpa [#allocation7], 0 }
   0x3   :  { %12 = vsyncpa [#allocation5], 0 }
   0x4   :  { %14 = vsyncpa [#allocation5 + $0x1], 0  ;;  %s1501_s12 = smov 0   ;;  %s1503_s13 = smov 0  }
   0x5   :  { %s1505_s14 = smov 0   ;;  %s1507_s15 = smov 0  }
   0x6 LB: > { %s1522_s16 = sadd.s32 4294967295, %s1467_s15   ;;  %s1096_s17 = sadd.s32 4294967294, %s1467_s15   ;;  %s1467_s15 = sphi %s1507_s15, %s1918_s15   ;;  %s1463_s14 = sphi %s1505_s14, %s1917_s14   ;;  %s1459_s13 = sphi %s1503_s13, %s1916_s13   ;;  %s1455_s12 = sphi %s1501_s12, %s1915_s12  }
   0x7   : > { %p40_p0 = scmp.ne.s32.totalorder %s1459_s13, %s1455_s12  ;;  %p1889_p1 = scmp.eq.s32.totalorder %s1522_s16, 0 }
   0x8   : > { %p112_p3 = scmp.eq.s32.totalorder %s1096_s17, 1  ;;  %p1097_p5 = scmp.ge.s32.totalorder %s1467_s15, 1 }
   0x9   : > { %p1531_p4 = por %p1889_p1, %p40_p0  ;;  %p119_p7 = scmp.lt.s32.totalorder %s1467_s15, 3 }
   0xa   : > { %p1536_p6 = por %p112_p3, %p40_p0  ;;  %s1469_s21 = smov [#allocation6]  }
   0xb   : > { %s1892_s18 = scalar_select %p1531_p4, 1, 0 }
   0xc   : > { %s1893_s19 = scalar_select %p1536_p6, 1, 0 }
   0xd   : > { %p1541_p8 = pnand %p1097_p5, %p119_p7  ;;  %s131_s22 = sshll.u32 %s1469_s21, 4  ;;  %s1545_s22 = int_to_ptr.vmem [resolvable:$true] %s131_s22 }
   0xe   : > { %s1470_s24 = smov [#allocation8]   ;;  %s1311_s28 = scalar_lea.hbm %s1886_s1, 192 }
   0xf   : > { %p1182_p9 = pneg %p1541_p8  ;;  %s144_s25 = sshll.u32 %s1470_s24, 4  ;;  %s1556_s25 = int_to_ptr.vmem [resolvable:$true] %s144_s25 }
  0x10   : > { %p1312_p12 = scmp.ne.s32.totalorder %s1886_s1, %s1311_s28  ;;  %p1318_p5 = scmp.lt.u32.totalorder %s1311_s28, %s1886_s1 }
  0x11   : > { %p1552_p11 = pnand %p1182_p9, %p1889_p1 }
  0x13   : > { %p1313_p13 = pneg %p1552_p11 }
  0x15   : > { %p1314_p0 = pnand %p1313_p13, %p1312_p12 }
  0x17   : > { %p1315_p3 = pneg %p1314_p0 }
  0x19   : > { %p1320_p7 = pnand %p1318_p5, %p1315_p3 }
  0x1b   : > { %1323 = shalt.err (!%p1320_p7)
}
  0x1c   : > { %s1324_s6 = scalar_lea.vmem %s1545_s22, 192  ;;  %p1332_p2 = scmp.lt.s32.totalorder %s1545_s22, %s1545_s22 }
  0x1d   : > { %p1325_p9 = scmp.ne.s32.totalorder %s1545_s22, %s1324_s6  ;;  %p1333_p12 = scmp.lt.s32.totalorder %s1324_s6, %s1324_s6 }
  0x1f   : > { %p1327_p10 = pnand %p1325_p9, %p1313_p13  ;;  %p1334_p0 = por %p1333_p12, %p1332_p2 }
  0x21   : > { %p1328_p1 = pneg %p1327_p10 }
  0x23   : > { %p1335_p6 = pnand %p1334_p0, %p1328_p1 }
  0x25   : > { %1338 = shalt.err (!%p1335_p6)
}
  0x26   : > { %s1471_s7 = smov 64   ;;  %s1472_s8 = smov 4  }
  0x27   : > { %1185 = dma.hbm_to_vmem [thread:$0]  (!%p1552_p11), %s1886_s1, 192, %s1545_s22, [#allocation7], %s1471_s7, %s1471_s7, %s1472_s8  }
  0x28   : > { %s1339_s21 = scalar_lea.hbm %s1887_s2, 192 }
  0x29   : > { %p1340_p2 = scmp.ne.s32.totalorder %s1887_s2, %s1339_s21  ;;  %p1346_p10 = scmp.lt.u32.totalorder %s1339_s21, %s1887_s2 }
  0x2b   : > { %p1342_p1 = pnand %p1340_p2, %p1313_p13 }
  0x2d   : > { %p1343_p6 = pneg %p1342_p1 }
  0x2f   : > { %p1348_p3 = pnand %p1346_p10, %p1343_p6 }
  0x31   : > { %1351 = shalt.err (!%p1348_p3)
}
  0x32   : > { %s1352_s22 = scalar_lea.vmem %s1556_s25, 192  ;;  %p1360_p12 = scmp.lt.s32.totalorder %s1556_s25, %s1556_s25 }
  0x33   : > { %p1353_p5 = scmp.ne.s32.totalorder %s1556_s25, %s1352_s22  ;;  %p1361_p0 = scmp.lt.s32.totalorder %s1352_s22, %s1352_s22 }
  0x35   : > { %p1355_p7 = pnand %p1353_p5, %p1313_p13  ;;  %p1362_p2 = por %p1361_p0, %p1360_p12 }
  0x37   : > { %p1356_p9 = pneg %p1355_p7 }
  0x39   : > { %p1363_p1 = pnand %p1362_p2, %p1356_p9 }
  0x3b   : > { %1366 = shalt.err (!%p1363_p1)
}
  0x3c   : > { %1188 = dma.hbm_to_vmem [thread:$0]  (!%p1552_p11), %s1887_s2, 192, %s1556_s25, [#allocation7], %s1471_s7, %s1471_s7, %s1472_s8  }
  0x3d   : > { %s1611_s4 = sadd.s32 1, %s1467_s15   ;;  %s27_s23 = sadd.s32 1, %s1463_s14 }
  0x3e   : > { %s24_s5 = ssub.s32 %s1467_s15, %s1611_s4  ;;  %p34_p13 = scmp.ne.s32.totalorder %s1463_s14, %s1459_s13 }
  0x3f   : > { %p25_p6 = scmp.eq.s32.totalorder %s24_s5, 0  ;;  %p35_p10 = scmp.eq.s32.totalorder %s1467_s15, 0 }
  0x40   : > { %p1896_p3 = scmp.eq.s32.totalorder %s1522_s16, 1  ;;  %p1199_p7 = scmp.lt.s32.totalorder %s1467_s15, 2 }
  0x41   : > { %s1627_s9 = scalar_select %p25_p6, %s1463_s14, %s27_s23  }
  0x42   : > { %p1621_p5 = por %p1896_p3, %p34_p13  ;;  %p36_p9 = por %p35_p10, %p34_p13 }
  0x43   : > { %s158_s10 = sand.u32 1, %s1463_s14   ;;  %s1132_s25 = sshll.u32 %s1467_s15, 7 }
  0x44   : > { %s1897_s6 = scalar_select %p1621_p5, 1, 0 }
  0x45   : > { %s1101_s11 = sshll.u32 %s158_s10, 3  ;;  %s1634_s17 = scalar_lea.hbm %s1885_s0, %s1132_s25 }
  0x46   : > { %s162_s21 = scalar_lea.vmem [#allocation3], %s1101_s11  ;;  %p1638_p11 = pnand %p1199_p7, %p36_p9 }
  0x47   : > { %s170_s24 = sshll.u32 %s162_s21, 4  ;;  %s159_s27 = scalar_lea.sflag [#allocation4], %s158_s10  ;;  %s1636_s24 = int_to_ptr.vmem [resolvable:$true] %s170_s24 }
  0x48   : > { %s1367_s28 = scalar_lea.hbm %s1634_s17, 128  ;;  %p1369_p0 = pneg %p1638_p11 }
  0x49   : > { %p1368_p12 = scmp.ne.s32.totalorder %s1634_s17, %s1367_s28  ;;  %s1372_s30 = scalar_lea.hbm %s1885_s0, 256 }
  0x4a   : > { %p1373_p13 = scmp.lt.u32.totalorder %s1634_s17, %s1885_s0  ;;  %p1374_p6 = scmp.lt.u32.totalorder %s1372_s30, %s1367_s28 }
  0x4b   : > { %p1370_p2 = pnand %p1369_p0, %p1368_p12  ;;  %p1376_p3 = scmp.lt.u32.totalorder %s1367_s28, %s1634_s17 }
  0x4c   : > { %p1375_p10 = por %p1374_p6, %p1373_p13 }
  0x4d   : > { %p1371_p1 = pneg %p1370_p2 }
  0x4e   : > { %p1377_p7 = por %p1376_p3, %p1375_p10 }
  0x50   : > { %p1378_p9 = pnand %p1377_p7, %p1371_p1 }
  0x52   : > { %1381 = shalt.err (!%p1378_p9)
}
  0x53   : > { %s1382_s10 = scalar_lea.vmem %s1636_s24, 128  ;;  %s1473_s11 = smov [#allocation3]  }
  0x54   : > { %p1383_p12 = scmp.ne.s32.totalorder %s1636_s24, %s1382_s10  ;;  %s1387_s25 = sshll.u32 %s1473_s11, 4  ;;  %s1388_s25 = int_to_ptr.vmem [resolvable:$false] %s1387_s25 }
  0x55   : > { %s1389_s7 = scalar_lea.vmem %s1388_s25, 256  ;;  %p1390_p4 = scmp.lt.s32.totalorder %s1636_s24, %s1388_s25 }
  0x56   : > { %p1385_p2 = pnand %p1383_p12, %p1369_p0  ;;  %p1391_p13 = scmp.lt.s32.totalorder %s1389_s7, %s1382_s10 }
  0x58   : > { %p1386_p5 = pneg %p1385_p2  ;;  %p1392_p6 = por %p1391_p13, %p1390_p4 }
  0x5a   : > { %p1393_p10 = pnand %p1392_p6, %p1386_p5 }
  0x5c   : > { %1396 = shalt.err (!%p1393_p10)
}
  0x5d   : > { %1192 = dma.hbm_to_vmem [thread:$0]  (!%p1638_p11), %s1634_s17, 128, %s1636_s24, %s159_s27  }
  0x5e   : > { %179 = sbr.rel (%p1541_p8) target bundleno = 1414 (0x586), region = 32  ;;  %s1670_s8 = sand.u32 (!%p1541_p8), 1, %s1459_s13  }
  0x5f   : > { %s1105_s21 = sshll.u32 (!%p1541_p8), %s1670_s8, 3  ;;  %s182_s28 = scalar_lea.sflag (!%p1541_p8), [#allocation4], %s1670_s8 }
  0x60   : > { %s185_s22 = scalar_lea.vmem (!%p1541_p8), [#allocation3], %s1105_s21  ;;  %p1899_p4 = scmp.ne.s32.totalorder (!%p1541_p8), %s1892_s18, 0 }
  0x65   : > { %1442 = dma.done.wait (%p1899_p4), %s182_s28, 128  }
  0x66   : > { %1444 = vsyncadd (%p1899_p4), %s182_s28, 4294967168  ;;  %p1900_p5 = scmp.eq.s32.totalorder %s1522_s16, 0 }
  0x68   : > { %1446 = dma.done.wait (%p1900_p5), [#allocation7], 384   ;;  %p1901_p8 = pmov %p1900_p5 }
  0x69   : > { %vm225_vm0 = vcmask 1044352   ;;  %v1474_v0 = vmov 0.0   ;;  %vm217_vm1 = vcmask 130048   ;;  %vm220_vm2 = vcmask 125952   ;;  %v1696_v1 = vld [vmem:[%s185_s22] sm:$0xff]  ;;  %s1475_s18 = smov 112  }
  0x6a   : > { %1448 = vsyncadd (%p1901_p8), [#allocation7], 4294966912  ;;  %219 = vst [vmem:[#allocation2 + $0x20] sm:$0xf] %v1474_v0  ;;  %396 = vmatprep.mubr.f32.mxu0 %v1474_v0  ;;  %476 = vmatprep.mubr.f32.mxu1 %v1474_v0  ;;  %vm222_vm3 = vcmask 1048448   ;;  %v274_v2 = vcombine.low %v1696_v1, %v1696_v1  ;;  %s1476_s20 = smov 16   ;;  %v261_v3 = vcombine.high %v1696_v1, %v1696_v1  ;;  %v228_v63 = vlaneseq }
  0x6b   : > { %224 = vst [vmem:[#allocation2 + $0x18] sm:$0xff] %v1474_v0  ;;  %226 = vst.msk [vmem:[#allocation2 + $0x30] sm:$0xf] %vm225_vm0, %v1474_v0  ;;  %278 = vrot.lane.b32.xlu1 %v1696_v1, %s1475_s18  ;;  %262 = vrot.lane.b32.xlu0 %v1696_v1, %s1476_s20  ;;  %vm270_vm4 = vcmask 1043584   ;;  %vm282_vm5 = vcmask 916480   ;;  %vm289_vm6 = vcmask 912384  }
  0x6c   : > { %227 = vst [vmem:[#allocation2 + $0x38] sm:$0xf] %v1474_v0  ;;  %218 = vst.msk [vmem:[#allocation2 + $0x8] sm:$0xff] %vm217_vm1, %v1474_v0  ;;  %vm327_vm7 = vcmask 1043456   ;;  %s1477_s17 = smov 1   ;;  %vm1478_vm8 = vmmov 1  }
  0x6d   : > { %221 = vst.msk [vmem:[#allocation2 + $0x28] sm:$0xf] %vm220_vm2, %v1474_v0  ;;  %276 = vst [vmem:[#allocation2 + $0x8] sm:$0xf0] %v274_v2  ;;  %vm323_vm10 = vcmask 97280   ;;  %s1479_s24 = smov 127  }
  0x6e   : > { %223 = vst.msk [vmem:[#allocation2 + $0x10] sm:$0xff] %vm222_vm3, %v1474_v0  ;;  %vm1718_vm9 = vmpackc.low %vm327_vm7, %vm1478_vm8  ;;  %v404_v24 = vld [vmem:[#allocation6 + $0x4] sm:$0xf]  ;;  %vm316_vm11 = vcmask 7168   ;;  %vm509_vm12 = vcmask 1039360   ;;  %v229_v2 = vand.u32 127, %v228_v63 }
  0x6f   : > { %277 = vst [vmem:[#allocation2 + $0x10] sm:$0xf0] %v1696_v1  ;;  %280 = vrot.lane.b32.xlu1 %v261_v3, %s1475_s18  ;;  %264 = vrot.lane.b32.xlu0 %v261_v3, %s1476_s20  ;;  %v291_v53 = vld [vmem:[#allocation6] sm:$0xf]  ;;  %v484_v60 = vld [vmem:[#allocation6 + $0x8] sm:$0xf] }
  0x70   : > { %v230_v3 = vadd.s32 128, %v229_v2  ;;  %v766_v63 = vld [vmem:[#allocation8 + $0x4] sm:$0xf]  ;;  %s1133_s26 = sshll.u32 %s1522_s16, 7  ;;  %s215_s27 = scalar_lea.vmem [#allocation9], %s1105_s21 }
  0x71   : > { %s1007_s29 = sshll.u32 %s215_s27, 4  ;;  %s1841_s5 = scalar_lea.hbm %s1888_s3, %s1133_s26  ;;  %s1843_s29 = int_to_ptr.vmem [resolvable:$true] %s1007_s29 }
  0x72   : > { %s993_s10 = scalar_lea.sflag [#allocation5], %s1670_s8  ;;  %s1397_s11 = scalar_lea.vmem %s1843_s29, 128 }
  0x73   : > { %v490_v23 = vld [vmem:[#allocation2 + $0x38] sm:$0xf]  ;;  %p1398_p11 = scmp.ne.s32.totalorder %s1843_s29, %s1397_s11  ;;  %p1912_p0 = scmp.ne.s32.totalorder %s1897_s6, 0 }
  0x74   : > { %s1480_s16 = smov [#allocation9]  }
  0x75   : > { %p1399_p1 = pnand %p1398_p11, %p1912_p0  ;;  %s1401_s25 = sshll.u32 %s1480_s16, 4  ;;  %s1402_s25 = int_to_ptr.vmem [resolvable:$false] %s1401_s25 }
  0x76   : > { %s1403_s7 = scalar_lea.vmem %s1402_s25, 256  ;;  %p1404_p7 = scmp.lt.s32.totalorder %s1843_s29, %s1402_s25 }
  0x77   : > { %p1400_p3 = pneg %p1399_p1  ;;  %p1405_p9 = scmp.lt.s32.totalorder %s1403_s7, %s1397_s11 }
  0x79   : > { %p1406_p12 = por %p1405_p9, %p1404_p7 }
  0x7b   : > { %p1407_p2 = pnand %p1406_p12, %p1400_p3 }
  0xdd   : > { %v279_v4 = vpop.permute.xlu1 %278  ;;  %v263_v5 = vpop.permute.xlu0 %262 }
  0xde   : > { %287 = vst.msk [vmem:[#allocation2 + $0x20] sm:$0xf] %vm225_vm0, %v279_v4 }
  0xdf   : > { %271 = vst.msk [vmem:[#allocation2 + $0x8] sm:$0xf] %vm270_vm4, %v263_v5 }
  0xe1   : > { %v281_v6 = vpop.permute.xlu1 %280  ;;  %v265_v7 = vpop.permute.xlu0 %264 }
  0xe2   : > { %v283_v8 = vsel %vm282_vm5, %v279_v4, %v281_v6  ;;  %290 = vst.msk [vmem:[#allocation2 + $0x30] sm:$0xf] %vm289_vm6, %v281_v6  ;;  %v266_v9 = vsel %vm217_vm1, %v263_v5, %v265_v7  ;;  %v235_v4 = vand.u32 15, %v229_v2  ;;  %v242_v5 = vand.u32 15, %v230_v3 }
  0xe3   : > { %273 = vst.msk [vmem:[#allocation2 + $0x18] sm:$0xf] %vm220_vm2, %v265_v7  ;;  %288 = vst [vmem:[#allocation2 + $0x28] sm:$0xf] %v283_v8 }
  0xe4   : > { %272 = vst [vmem:[#allocation2 + $0x10] sm:$0xf] %v266_v9  ;;  %vm1753_vm13 = vcmp.ne.s32.totalorder %v235_v4, 0  ;;  %vm1757_vm14 = vcmp.ne.s32.totalorder %v242_v5, 0  ;;  %vm1765_vm15 = vcmp.ne.s32.totalorder %v235_v4, 15  ;;  %vm1769_vm3 = vcmp.ne.s32.totalorder %v242_v5, 15 }
  0xe5   : > { %v295_v10 = vld [vmem:[#allocation2 + $0x20] sm:$0xf]  ;;  %v852_v5 = vld [vmem:[#allocation2 + $0x38] sm:$0xf] }
  0xe6   : > { %v1245_v11 = vpack.i.bf16 %v295_v10, %v1474_v0  ;;  %v293_v16 = vld [vmem:[#allocation2 + $0x8] sm:$0xff] }
  0xe8   : > { %1246 = vrot.lane.b32.xlu0 %v1245_v11, %s1477_s17 }
  0xe9   : > { %v297_v12 = vld [vmem:[#allocation2 + $0x30] sm:$0xf] }
  0xea   : > { %v296_v15 = vld [vmem:[#allocation2 + $0x28] sm:$0xf]  ;;  %v487_v21 = vld [vmem:[#allocation2 + $0x18] sm:$0xff]  ;;  %v489_v22 = vld [vmem:[#allocation2 + $0x30] sm:$0xf] }
  0xeb   : > { %v294_v14 = vld [vmem:[#allocation2 + $0x10] sm:$0xff]  ;;  %v1260_v18 = vpack.i.bf16 %v297_v12, %v296_v15  ;;  %v1143_v20 = vpack.c.bf16 %v296_v15, %v293_v16  ;;  %v1255_v26 = vpack.i.bf16 %v490_v23, %v489_v22  ;;  %v488_v27 = vld [vmem:[#allocation2 + $0x28] sm:$0xf] }
  0xec   : > { %v1140_v17 = vpack.c.bf16 %v297_v12, %v294_v14  ;;  %v1250_v19 = vpack.i.bf16 %v294_v14, %v293_v16  ;;  %v1265_v25 = vpack.i.bf16 %v487_v21, %v294_v14  ;;  %v1270_v28 = vpack.i.bf16 %v488_v27, %v293_v16 }
  0xed   : > { %1261 = vrot.lane.b32.xlu1 %v1260_v18, %s1477_s17 }
  0xee   : > { %1142 = vmatprep.subr.msk.bf16.mxu1 %vm1718_vm9, %v1140_v17  ;;  %1251 = vrot.lane.b32.xlu0 %v1250_v19, %s1477_s17 }
  0xef   : > { %1145 = vmatpush1.bf16.msk.msra.mxu1 %vm1718_vm9, %v1143_v20 }
  0xf1   : > { %1266 = vrot.lane.b32.xlu1 %v1265_v25, %s1479_s24 }
  0xf2   : > { %1114 = vmatmul.mubr.msk.f32.vlgmr.msra.gmra.mrb[0].mxu1 %vm323_vm10, %v404_v24  ;;  %1256 = vrot.lane.b32.xlu0 %v1255_v26, %s1479_s24 }
  0xf3   : > { %758 = vmatprep.mubr.f32.mxu1 %v1474_v0 }
  0xf5   : > { %1271 = vrot.lane.b32.xlu1 %v1270_v28, %s1479_s24 }
 0x15a   : > { %v1247_v29 = vpop.permute.xlu0 %1246 }
 0x15b   : > { %v1249_v31 = vunpack.i.h.bf16 %v1247_v29  ;;  %v1248_v35 = vunpack.i.l.bf16 %v1247_v29 }
 0x15f   : > { %v1262_v30 = vpop.permute.xlu1 %1261 }
 0x160   : > { %v1264_v32 = vunpack.i.h.bf16 %v1262_v30  ;;  %v1263_v33 = vunpack.i.l.bf16 %v1262_v30  ;;  %v1252_v34 = vpop.permute.xlu0 %1251 }
 0x161   : > { %v1254_v36 = vunpack.i.h.bf16 %v1252_v34  ;;  %v1253_v37 = vunpack.i.l.bf16 %v1252_v34 }
 0x162   : > { %v320_v38 = vsel %vm316_vm11, %v1263_v33, %v1264_v32  ;;  %v319_v39 = vsel %vm316_vm11, %v1249_v31, %v1263_v33 }
 0x163   : > { %v1267_v40 = vpop.permute.xlu1 %1266  ;;  %v318_v41 = vsel %vm316_vm11, %v1253_v37, %v1254_v36  ;;  %v317_v42 = vsel %vm316_vm11, %v1248_v35, %v1253_v37 }
 0x164   : > { %v1269_v43 = vunpack.i.h.bf16 %v1267_v40  ;;  %v1268_v44 = vunpack.i.l.bf16 %v1267_v40  ;;  %v1257_v45 = vpop.permute.xlu0 %1256  ;;  %v1134_v46 = vpack.c.bf16 %v320_v38, %v318_v41  ;;  %v1137_v47 = vpack.c.bf16 %v319_v39, %v317_v42 }
 0x165   : > { %v1259_v48 = vunpack.i.h.bf16 %v1257_v45  ;;  %v1258_v49 = vunpack.i.l.bf16 %v1257_v45 }
 0x166   : > { %v511_v50 = vsel %vm509_vm12, %v1268_v44, %v1269_v43  ;;  %1136 = vmatprep.subr.msk.bf16.mxu0 %vm1718_vm9, %v1134_v46 }
 0x167   : > { %v513_v51 = vsel %vm509_vm12, %v1258_v49, %v1259_v48  ;;  %1139 = vmatpush1.bf16.msk.msra.mxu0 %vm1718_vm9, %v1137_v47  ;;  %v1272_v52 = vpop.permute.xlu1 %1271 }
 0x168   : > { %v1146_v54 = vpack.c.bf16 %v513_v51, %v511_v50  ;;  %v1274_v55 = vunpack.i.h.bf16 %v1272_v52  ;;  %v1273_v56 = vunpack.i.l.bf16 %v1272_v52 }
 0x16a   : > { %v510_v57 = vsel %vm509_vm12, %v1273_v56, %v1268_v44  ;;  %v512_v58 = vsel %vm509_vm12, %v1274_v55, %v1258_v49  ;;  %1148 = vmatprep.subr.msk.bf16.mxu0 %vm1718_vm9, %v1146_v54  ;;  %1111 = vmatmul.mubr.msk.f32.vlgmr.msra.gmra.mrb[0].mxu0 %vm323_vm10, %v291_v53 }
 0x16b   : > { %v1149_v59 = vpack.c.bf16 %v512_v58, %v510_v57  ;;  %587 = vmatprep.mubr.f32.mxu0 %v1474_v0 }
 0x16d   : > { %1151 = vmatpush1.bf16.msk.msra.mxu0 %vm1718_vm9, %v1149_v59 }
 0x170   : > { %1117 = vmatmul.mubr.msk.f32.vlgmr.msra.gmra.mrb[2].mxu0 %vm323_vm10, %v484_v60 }
 0x171   : > { %838 = vmatprep.mubr.f32.mxu0 %v1474_v0 }
 0x1c5   : > { %v478_v61 = vpop.f32.mrb[0].mxu1 }
 0x1c6   : > { %v480_v62 = vpop.f32.mrb[1].mxu1 }
 0x23d   : > { %v398_v8 = vpop.f32.mrb[0].mxu0 }
 0x23e   : > { %v594_v9 = vsel %vm1753_vm13, %v398_v8, 0.0  ;;  %v400_v10 = vpop.f32.mrb[1].mxu0 }
 0x23f   : > { %v595_v11 = vsel %vm1757_vm14, %v400_v10, 0.0  ;;  %v596_v12 = vadd.f32 %v594_v9, %v478_v61 }
 0x240   : > { %v597_v14 = vadd.f32 %v595_v11, %v480_v62 }
 0x243   : > { %v589_v17 = vpop.f32.mrb[2].mxu0 }
 0x244   : > { %v598_v18 = vsel %vm1765_vm15, %v589_v17, 0.0  ;;  %v591_v19 = vpop.f32.mrb[3].mxu0 }
 0x245   : > { %v600_v20 = vadd.f32 %v598_v18, %v596_v12  ;;  %v599_v21 = vsel %vm1769_vm3, %v591_v19, 0.0 }
 0x246   : > { %v601_v22 = vadd.f32 %v599_v21, %v597_v14 }
 0x247   : > { %v602_v23 = vsel %vm327_vm7, %v600_v20, 0.0  ;;  %v608_v24 = vmul.f32 %v600_v20, %v600_v20 }
 0x248   : > { %v603_v25 = vsel %vm327_vm7, %v601_v22, 0.0  ;;  %v609_v26 = vmul.f32 %v601_v22, %v601_v22 }
 0x249   : > { %v604_v27 = vadd.f32 %v603_v25, %v602_v23  ;;  %v610_v28 = vsel %vm327_vm7, %v608_v24, 0.0 }
 0x24a   : > { %v611_v29 = vsel %vm327_vm7, %v609_v26, 0.0 }
 0x24b   : > { %605 = vadd.xlane.f32.xlu0 %v604_v27  ;;  %v612_v30 = vadd.f32 %v611_v29, %v610_v28 }
 0x24d   : > { %613 = vadd.xlane.f32.xlu1 %v612_v30 }
 0x2d8   : > { %v606_v31 = vpop.xlane.xlu0 %605 }
 0x2d9   : > { %v607_v32 = vmul.f32 0.00390625, %v606_v31 }
 0x2da   : > { %v614_v33 = vpop.xlane.xlu1 %613 }
 0x2db   : > { %v615_v34 = vmul.f32 0.00390625, %v614_v33  ;;  %v616_v35 = vmul.f32 %v607_v32, %v607_v32  ;;  %v618_v38 = vsub.f32 %v600_v20, %v607_v32  ;;  %v619_v39 = vsub.f32 %v601_v22, %v607_v32 }
 0x2dd   : > { %v617_v36 = vsub.f32 %v615_v34, %v616_v35 }
 0x2df   : > { %v620_v37 = vadd.f32 1e-05, %v617_v36 }
 0x2e1   : > { %1307 = vrsqrt.f32 %v620_v37 }
 0x2eb   : > { %v1308_v40 = vpop.eup %1307 }
 0x2ec   : > { %v623_v41 = vmul.f32 %v1308_v40, %v619_v39  ;;  %v622_v42 = vmul.f32 %v1308_v40, %v618_v38  ;;  %v656_v40 = vld [vmem:[#allocation8] sm:$0xf] }
 0x2ee   : > { %v625_v43 = vmax.f32 %v623_v41, 0.0  ;;  %v624_v44 = vmax.f32 %v622_v42, 0.0 }
 0x2f0   : > { %630 = vrot.lane.b32.xlu1 %v625_v43, %s1476_s20  ;;  %v640_v45 = vrot.slane %v625_v43, 4  ;;  %628 = vrot.lane.b32.xlu0 %v624_v44, %s1476_s20  ;;  %v639_v46 = vrot.slane %v624_v44, 4 }
 0x2f2   : > { %644 = vst [vmem:[#allocation2 + $0x10] sm:$0xf0] %v640_v45  ;;  %643 = vst [vmem:[#allocation2 + $0x8] sm:$0xf0] %v639_v46  ;;  %v846_v45 = vld [vmem:[#allocation8 + $0x8] sm:$0xf] }
 0x2f4   : > { %647 = vrot.lane.b32.xlu1 %v625_v43, %s1475_s18  ;;  %645 = vrot.lane.b32.xlu0 %v624_v44, %s1475_s18 }
 0x362   : > { %v631_v47 = vpop.permute.xlu1 %630  ;;  %v629_v48 = vpop.permute.xlu0 %628 }
 0x363   : > { %638 = vst.msk [vmem:[#allocation2 + $0x18] sm:$0xf] %vm220_vm2, %v631_v47  ;;  %v632_v49 = vsel %vm217_vm1, %v629_v48, %v631_v47 }
 0x364   : > { %636 = vst.msk [vmem:[#allocation2 + $0x8] sm:$0xf] %vm270_vm4, %v629_v48  ;;  %637 = vst [vmem:[#allocation2 + $0x10] sm:$0xf] %v632_v49 }
 0x366   : > { %v648_v50 = vpop.permute.xlu1 %647  ;;  %v646_v51 = vpop.permute.xlu0 %645 }
 0x367   : > { %655 = vst.msk [vmem:[#allocation2 + $0x30] sm:$0xf] %vm289_vm6, %v648_v50  ;;  %v649_v52 = vsel %vm282_vm5, %v646_v51, %v648_v50 }
 0x368   : > { %653 = vst.msk [vmem:[#allocation2 + $0x20] sm:$0xf] %vm225_vm0, %v646_v51  ;;  %654 = vst [vmem:[#allocation2 + $0x28] sm:$0xf] %v649_v52 }
 0x36a   : > { %v849_v62 = vld [vmem:[#allocation2 + $0x18] sm:$0xff] }
 0x36b   : > { %v659_v53 = vld [vmem:[#allocation2 + $0x10] sm:$0xff]  ;;  %v658_v59 = vld [vmem:[#allocation2 + $0x8] sm:$0xff] }
 0x36c   : > { %v1280_v2 = vpack.i.bf16 %v659_v53, %v658_v59  ;;  %v1295_v3 = vpack.i.bf16 %v849_v62, %v659_v53 }
 0x36e   : > { %v662_v54 = vld [vmem:[#allocation2 + $0x30] sm:$0xf] }
 0x36f   : > { %v660_v55 = vld [vmem:[#allocation2 + $0x20] sm:$0xf]  ;;  %v1158_v56 = vpack.c.bf16 %v662_v54, %v659_v53  ;;  %v661_v58 = vld [vmem:[#allocation2 + $0x28] sm:$0xf]  ;;  %v851_v4 = vld [vmem:[#allocation2 + $0x30] sm:$0xf] }
 0x370   : > { %v1275_v57 = vpack.i.bf16 %v660_v55, %v1474_v0  ;;  %v1290_v60 = vpack.i.bf16 %v662_v54, %v661_v58  ;;  %v1161_v61 = vpack.c.bf16 %v661_v58, %v658_v59  ;;  %v850_v8 = vld [vmem:[#allocation2 + $0x28] sm:$0xf]  ;;  %v1285_v9 = vpack.i.bf16 %v852_v5, %v851_v4 }
 0x371   : > { %1160 = vmatprep.subr.msk.bf16.mxu0 %vm1718_vm9, %v1158_v56  ;;  %v1300_v10 = vpack.i.bf16 %v850_v8, %v658_v59 }
 0x372   : > { %1276 = vrot.lane.b32.xlu0 %v1275_v57, %s1477_s17  ;;  %1291 = vrot.lane.b32.xlu1 %v1290_v60, %s1477_s17 }
 0x373   : > { %1163 = vmatpush1.bf16.msk.msra.mxu0 %vm1718_vm9, %v1161_v61 }
 0x376   : > { %1281 = vrot.lane.b32.xlu0 %v1280_v2, %s1477_s17  ;;  %1123 = vmatmul.mubr.msk.f32.vlgmr.msra.gmra.mrb[4].mxu0 %vm323_vm10, %v766_v63 }
 0x377   : > { %1296 = vrot.lane.b32.xlu1 %v1295_v3, %s1479_s24 }
 0x37a   : > { %1286 = vrot.lane.b32.xlu0 %v1285_v9, %s1479_s24 }
 0x37b   : > { %1301 = vrot.lane.b32.xlu1 %v1300_v10, %s1479_s24 }
 0x3e4   : > { %v1277_v11 = vpop.permute.xlu0 %1276  ;;  %v1292_v12 = vpop.permute.xlu1 %1291 }
 0x3e5   : > { %v1279_v14 = vunpack.i.h.bf16 %v1277_v11  ;;  %v1294_v17 = vunpack.i.h.bf16 %v1292_v12  ;;  %v1293_v18 = vunpack.i.l.bf16 %v1292_v12  ;;  %v1278_v20 = vunpack.i.l.bf16 %v1277_v11 }
 0x3e7   : > { %v683_v24 = vsel %vm316_vm11, %v1279_v14, %v1293_v18  ;;  %v684_v25 = vsel %vm316_vm11, %v1293_v18, %v1294_v17 }
 0x3e8   : > { %v1282_v19 = vpop.permute.xlu0 %1281 }
 0x3e9   : > { %v1284_v21 = vunpack.i.h.bf16 %v1282_v19  ;;  %v1283_v22 = vunpack.i.l.bf16 %v1282_v19  ;;  %v1297_v23 = vpop.permute.xlu1 %1296 }
 0x3ea   : > { %v1299_v28 = vunpack.i.h.bf16 %v1297_v23  ;;  %v1298_v29 = vunpack.i.l.bf16 %v1297_v23 }
 0x3eb   : > { %v681_v26 = vsel %vm316_vm11, %v1278_v20, %v1283_v22  ;;  %v682_v27 = vsel %vm316_vm11, %v1283_v22, %v1284_v21 }
 0x3ec   : > { %v1152_v30 = vpack.c.bf16 %v684_v25, %v682_v27  ;;  %v1155_v31 = vpack.c.bf16 %v683_v24, %v681_v26  ;;  %v1287_v32 = vpop.permute.xlu0 %1286  ;;  %v872_v38 = vsel %vm509_vm12, %v1298_v29, %v1299_v28 }
 0x3ed   : > { %v1289_v33 = vunpack.i.h.bf16 %v1287_v32  ;;  %v1288_v34 = vunpack.i.l.bf16 %v1287_v32  ;;  %v1302_v35 = vpop.permute.xlu1 %1301 }
 0x3ee   : > { %v1304_v36 = vunpack.i.h.bf16 %v1302_v35  ;;  %v1303_v37 = vunpack.i.l.bf16 %v1302_v35  ;;  %1154 = vmatprep.subr.msk.bf16.mxu1 %vm1718_vm9, %v1152_v30 }
 0x3ef   : > { %v874_v39 = vsel %vm509_vm12, %v1288_v34, %v1289_v33  ;;  %1157 = vmatpush1.bf16.msk.msra.mxu1 %vm1718_vm9, %v1155_v31 }
 0x3f0   : > { %v1164_v41 = vpack.c.bf16 %v874_v39, %v872_v38  ;;  %v871_v42 = vsel %vm509_vm12, %v1303_v37, %v1298_v29  ;;  %v873_v43 = vsel %vm509_vm12, %v1304_v36, %v1288_v34 }
 0x3f1   : > { %v1167_v44 = vpack.c.bf16 %v873_v43, %v871_v42 }
 0x3f2   : > { %1120 = vmatmul.mubr.msk.f32.vlgmr.msra.gmra.mrb[2].mxu1 %vm323_vm10, %v656_v40  ;;  %1166 = vmatprep.subr.msk.bf16.mxu1 %vm1718_vm9, %v1164_v41 }
 0x3f3   : > { %1169 = vmatpush1.bf16.msk.msra.mxu1 %vm1718_vm9, %v1167_v44  ;;  %948 = vmatprep.mubr.f32.mxu1 %v1474_v0 }
 0x3f6   : > { %1126 = vmatmul.mubr.msk.f32.vlgmr.msra.gmra.mrb[4].mxu1 %vm323_vm10, %v846_v45 }
 0x449   : > { %v840_v46 = vpop.f32.mrb[4].mxu0 }
 0x44a   : > { %v842_v47 = vpop.f32.mrb[5].mxu0 }
 0x4c5   : > { %v760_v48 = vpop.f32.mrb[2].mxu1 }
 0x4c6   : > { %v955_v49 = vsel %vm1753_vm13, %v760_v48, 0.0  ;;  %v762_v50 = vpop.f32.mrb[3].mxu1 }
 0x4c7   : > { %v956_v51 = vsel %vm1757_vm14, %v762_v50, 0.0  ;;  %v957_v52 = vadd.f32 %v955_v49, %v840_v46 }
 0x4c8   : > { %v958_v53 = vadd.f32 %v956_v51, %v842_v47 }
 0x4c9   : > { %v950_v54 = vpop.f32.mrb[4].mxu1 }
 0x4ca   : > { %v959_v13 = vsel %vm1765_vm15, %v950_v54, 0.0  ;;  %v952_v0 = vpop.f32.mrb[5].mxu1 }
 0x4cb   : > { %v961_v55 = vadd.f32 %v959_v13, %v957_v52  ;;  %v960_v56 = vsel %vm1769_vm3, %v952_v0, 0.0 }
 0x4cc   : > { %v962_v57 = vadd.f32 %v960_v56, %v958_v53 }
 0x4cd   : > { %v963_v58 = vsel %vm327_vm7, %v961_v55, 0.0  ;;  %v969_v6 = vmul.f32 %v961_v55, %v961_v55 }
 0x4ce   : > { %v964_v59 = vsel %vm327_vm7, %v962_v57, 0.0  ;;  %v970_v60 = vmul.f32 %v962_v57, %v962_v57 }
 0x4cf   : > { %v965_v7 = vadd.f32 %v964_v59, %v963_v58  ;;  %v971_v61 = vsel %vm327_vm7, %v969_v6, 0.0 }
 0x4d0   : > { %v972_v62 = vsel %vm327_vm7, %v970_v60, 0.0 }
 0x4d1   : > { %966 = vadd.xlane.f32.xlu0 %v965_v7  ;;  %v973_v15 = vadd.f32 %v972_v62, %v971_v61 }
 0x4d3   : > { %974 = vadd.xlane.f32.xlu1 %v973_v15 }
 0x55e   : > { %v967_v63 = vpop.xlane.xlu0 %966 }
 0x55f   : > { %v968_v16 = vmul.f32 0.00390625, %v967_v63 }
 0x560   : > { %v975_v2 = vpop.xlane.xlu1 %974 }
 0x561   : > { %v976_v3 = vmul.f32 0.00390625, %v975_v2  ;;  %v977_v4 = vmul.f32 %v968_v16, %v968_v16  ;;  %v979_v9 = vsub.f32 %v961_v55, %v968_v16  ;;  %v980_v10 = vsub.f32 %v962_v57, %v968_v16 }
 0x563   : > { %v978_v5 = vsub.f32 %v976_v3, %v977_v4 }
 0x565   : > { %v981_v8 = vadd.f32 1e-05, %v978_v5 }
 0x567   : > { %1309 = vrsqrt.f32 %v981_v8 }
 0x571   : > { %v1310_v11 = vpop.eup %1309 }
 0x572   : > { %v983_v12 = vmul.f32 %v1310_v11, %v979_v9  ;;  %v984_v14 = vmul.f32 %v1310_v11, %v980_v10 }
 0x574   : > { %v988_v17 = vcombine.low %v983_v12, %v984_v14 }
 0x576   : > { %v990_v18 = vadd.f32 %v988_v17, %v1696_v1 }
 0x578   : > { %991 = vst [vmem:[%s215_s27] sm:$0xff] %v990_v18 }
 0x579   : > { %1410 = shalt.err (!%p1407_p2)
}
 0x57a   : > { %s1411_s8 = scalar_lea.hbm %s1841_s5, 128  ;;  %s1415_s22 = scalar_lea.hbm %s1888_s3, 256 }
 0x57b   : > { %p1412_p13 = scmp.ne.s32.totalorder %s1841_s5, %s1411_s8  ;;  %p1416_p4 = scmp.lt.u32.totalorder %s1841_s5, %s1888_s3 }
 0x57c   : > { %p1417_p5 = scmp.lt.u32.totalorder %s1415_s22, %s1411_s8  ;;  %p1419_p11 = scmp.lt.u32.totalorder %s1411_s8, %s1841_s5 }
 0x57d   : > { %p1413_p6 = pnand %p1412_p13, %p1912_p0 }
 0x57e   : > { %p1418_p8 = por %p1417_p5, %p1416_p4 }
 0x57f   : > { %p1414_p10 = pneg %p1413_p6 }
 0x580   : > { %p1420_p1 = por %p1419_p11, %p1418_p8 }
 0x582   : > { %p1421_p3 = pnand %p1420_p1, %p1414_p10 }
 0x584   : > { %1424 = shalt.err (!%p1421_p3)
}
 0x585   : > { %1180 = dma.vmem_to_hbm [thread:$0]  (%p1912_p0), %s1843_s29, 128, %s1841_s5, %s993_s10  }
 0x586 PF: > { %s1019_s17 = sand.u32 1, %s1455_s12   ;;  %p1913_p7 = scmp.ne.s32.totalorder %s1893_s19, 0 }
 0x587   : > { %p1914_p9 = scmp.ge.s32.totalorder %s1467_s15, 2  ;;  %s1020_s24 = scalar_lea.sflag [#allocation5], %s1019_s17 }
 0x589   : > { %p1194_p12 = pnand %p1914_p9, %p1913_p7 }
 0x58b   : > { %1450 = dma.done.wait (!%p1194_p12), %s1020_s24, 128  }
 0x58c   : > { %1452 = vsyncadd (!%p1194_p12), %s1020_s24, 4294967168  ;;  %p17_p2 = scmp.ge.s32.totalorder %s1611_s4, 4   ;;  %s1915_s12 = smov %s1459_s13 }
 0x58d   : > { %s1916_s13 = smov %s1463_s14  ;;  %s1917_s14 = smov %s1627_s9 }
 0x58e   : > { %s1918_s15 = smov %s1611_s4  ;;  %19 = sbr.rel (!%p17_p2) target bundleno = 6 (0x6), region = 89 }
 0x595   :  { %1025 = vsyncpa [#allocation4], 1 }
 0x596   :  { %1027 = vsyncpa [#allocation4 + $0x1], 1 }
 0x597   :  { %1028 = vsyncpa [#allocation7], 1 }
 0x598   :  { %1029 = vsyncpa [#allocation5], 1 }
 0x599   :  { %1031 = vsyncpa [#allocation5 + $0x1], 1 }

</bundles_post_ra>
